<compile_context>
chip_gen: v6e
topology: v6e:2x2x1
jax: 0.10.0
libtpu: 0.0.40
codegen_flags: <defaults>
</compile_context>

<pallas_src>
import functools

import jax
import jax.numpy as jnp
from jax.experimental import pallas as pl
from jax.experimental.pallas import tpu as pltpu

NEG_SLOPE = 0.1   # LeakyReLU negative_slope from act_cfg
BN_EPS = 1e-5
LANE = 128        # TPU lane width; channel dims are padded to a multiple of it


def _round_up(x, m):
    return (x + m - 1) // m * m


def _pick_row_tile(h, max_rows=8):
    """Largest divisor of h that is <= max_rows (row-tile height).

    Bounds the per-step VMEM footprint (im2col patch + f32 accumulator) while
    keeping the matmul M dimension = tH*W a multiple of 8 at the demo shapes.
    """
    for t in range(min(h, max_rows), 0, -1):
        if h % t == 0:
            return t
    return 1


def _single_head_kernel(x_ref, xtop_ref, xbot_ref, w1_ref, scale_ref,
                        bias1_ref, w2_ref, b2_ref, out_ref,
                        xpad_scr, patch_scr, *, tH, W, Cin):
    """One (row-tile, batch) grid step of the fused SingleHead.

    x_ref    : (1, tH, W, Cin)   bf16  interior rows of this tile
    xtop_ref : (1, 1, W, Cin)    bf16  row just above the tile (clamped)
    xbot_ref : (1, 1, W, Cin)    bf16  row just below the tile (clamped)
    w1_ref   : (9*Cin, Cmid_p)   bf16  3x3 conv weights, taps folded into K
    scale_ref: (1, Cmid_p)       f32   folded BN scale (0 in padded lanes)
    bias1_ref: (1, Cmid_p)       f32   folded BN bias  (0 in padded lanes)
    w2_ref   : (Cmid_p, Cout_p)  bf16  1x1 conv weights (zero padded)
    b2_ref   : (1, Cout_p)       f32   1x1 conv bias    (zero padded)
    out_ref  : (1, tH*W, Cout_p) f32   lane-dense flat output tile
    xpad_scr : (tH+2, W+2, Cin)  f32   zero-bordered input tile (VMEM)
    patch_scr: (tH*W, 9*Cin)     f32   im2col patch (taps along K) (VMEM)
    """
    t = pl.program_id(0)
    n_tiles = pl.num_programs(0)

    # --- build the zero-bordered input tile in VMEM (replaces wrapper jnp.pad)
    zero_row = jnp.zeros((1, W + 2, Cin), jnp.float32)
    zero_col = jnp.zeros((tH + 2, 1, Cin), jnp.float32)
    xpad_scr[0:1, :, :] = zero_row
    xpad_scr[tH + 1:tH + 2, :, :] = zero_row
    xpad_scr[:, 0:1, :] = zero_col
    xpad_scr[:, W + 1:W + 2, :] = zero_col
    xpad_scr[1:tH + 1, 1:W + 1, :] = x_ref[0].astype(jnp.float32)

    @pl.when(t > 0)                      # top halo row from the tile above
    def _():
        xpad_scr[0:1, 1:W + 1, :] = xtop_ref[0].astype(jnp.float32)

    @pl.when(t < n_tiles - 1)            # bottom halo row from the tile below
    def _():
        xpad_scr[tH + 1:tH + 2, 1:W + 1, :] = xbot_ref[0].astype(jnp.float32)

    # --- im2col: fold all 9 taps into the contraction dimension
    for ky in range(3):
        for kx in range(3):
            tap = ky * 3 + kx
            src = xpad_scr[ky:ky + tH, kx:kx + W, :]          # (tH, W, Cin)
            patch_scr[:, tap * Cin:(tap + 1) * Cin] = src.reshape(tH * W, Cin)

    # --- 3x3 conv as ONE MXU matmul: bf16 x bf16 -> f32 accumulate
    acc = jnp.dot(patch_scr[...].astype(jnp.bfloat16), w1_ref[...],
                  preferred_element_type=jnp.float32)          # (tH*W, Cmid_p)

    # --- folded BatchNorm (eval) + LeakyReLU(0.1), in f32
    y = acc * scale_ref[0] + bias1_ref[0]
    y = jnp.where(y > 0, y, NEG_SLOPE * y).astype(jnp.bfloat16)

    # --- 1x1 conv == channel matmul + bias, lane-dense (Cout_p = 128k) store
    z = jnp.dot(y, w2_ref[...], preferred_element_type=jnp.float32) + b2_ref[0]
    out_ref[0] = z


def single_head_forward(x_nhwc, p):
    """Fused SingleHead forward for one scale. x_nhwc: (N, H, W, Cin) f32."""
    N, H, W, Cin = x_nhwc.shape
    Cmid = p["w1"].shape[-1]
    Cout = p["w2"].shape[-1]
    Cmid_p = _round_up(Cmid, LANE)
    Cout_p = _round_up(Cout, LANE)

    # Pack weights: taps folded into K, channels zero-padded to lane multiples,
    # matmul operands cast to bf16 (accumulation stays f32 inside the kernel).
    w1 = jnp.zeros((9 * Cin, Cmid_p), jnp.float32)
    w1 = w1.at[:, :Cmid].set(p["w1"].reshape(9 * Cin, Cmid)).astype(jnp.bfloat16)
    scale = jnp.zeros((1, Cmid_p), jnp.float32).at[0, :Cmid].set(p["bn_scale"])
    bias1 = jnp.zeros((1, Cmid_p), jnp.float32).at[0, :Cmid].set(p["bn_bias"])
    w2 = jnp.zeros((Cmid_p, Cout_p), jnp.float32)
    w2 = w2.at[:Cmid, :Cout].set(p["w2"]).astype(jnp.bfloat16)
    b2 = jnp.zeros((1, Cout_p), jnp.float32).at[0, :Cout].set(p["b2"])

    x_bf = x_nhwc.astype(jnp.bfloat16)   # halves input HBM traffic

    tH = _pick_row_tile(H)
    n_tiles = H // tH
    M = tH * W                           # matmul M dim / rows per output tile

    kernel = functools.partial(_single_head_kernel, tH=tH, W=W, Cin=Cin)
    out = pl.pallas_call(
        kernel,
        out_shape=jax.ShapeDtypeStruct((N, H * W, Cout_p), jnp.float32),
        grid_spec=pltpu.PrefetchScalarGridSpec(
            num_scalar_prefetch=0,
            grid=(n_tiles, N),           # row tiles leading (v7x megacore split)
            in_specs=[
                # interior rows of the row tile
                pl.BlockSpec((1, tH, W, Cin), lambda t, n: (n, t, 0, 0)),
                # 1-row halo views (block size 1 => element row index), clamped
                # at the image border and masked with pl.when inside the kernel
                pl.BlockSpec((1, 1, W, Cin),
                             lambda t, n: (n, jnp.maximum(t * tH - 1, 0), 0, 0)),
                pl.BlockSpec((1, 1, W, Cin),
                             lambda t, n: (n, jnp.minimum((t + 1) * tH, H - 1), 0, 0)),
                # weights / BN params: constant block index => stay VMEM-resident
                pl.BlockSpec((9 * Cin, Cmid_p), lambda t, n: (0, 0)),
                pl.BlockSpec((1, Cmid_p), lambda t, n: (0, 0)),
                pl.BlockSpec((1, Cmid_p), lambda t, n: (0, 0)),
                pl.BlockSpec((Cmid_p, Cout_p), lambda t, n: (0, 0)),
                pl.BlockSpec((1, Cout_p), lambda t, n: (0, 0)),
            ],
            out_specs=pl.BlockSpec((1, M, Cout_p), lambda t, n: (n, t, 0)),
            scratch_shapes=[
                pltpu.VMEM((tH + 2, W + 2, Cin), jnp.float32),  # padded tile
                pltpu.VMEM((M, 9 * Cin), jnp.float32),          # im2col patch
            ],
        ),
        compiler_params=pltpu.CompilerParams(
            dimension_semantics=("parallel", "parallel")),
    )(x_bf, x_bf, x_bf, w1, scale, bias1, w2, b2)

    # Layout plumbing outside the kernel: drop padded channels, restore (H, W).
    return out[:, :, :Cout].reshape(N, H, W, Cout)


def yolo_head_forward(feats_nchw, params):
    """feats_nchw: tuple of (N, Cin_i, H_i, W_i). Returns tuple of NCHW outputs."""
    assert len(feats_nchw) == len(params)
    outs = []
    for x, p in zip(feats_nchw, params):
        # NOTE: if the surrounding model is kept in NHWC these two transposes
        # (one full HBM pass each over the small activations) disappear.
        x_nhwc = jnp.transpose(x, (0, 2, 3, 1))
        y_nhwc = single_head_forward(x_nhwc, p)
        outs.append(jnp.transpose(y_nhwc, (0, 3, 1, 2)))  # back to NCHW
    return tuple(outs)


def init_yolo_head_params(key, num_classes, in_channels):
    """Deterministic synthetic parameters (BatchNorm folded in eval mode)."""
    cout = (num_classes + 5) * 3
    params = []
    for in_ch in in_channels:
        cmid = in_ch * 2
        key, k1, k2, k3 = jax.random.split(key, 4)
        w1 = jax.random.normal(k1, (3, 3, in_ch, cmid), jnp.float32) * 0.05  # HWIO
        gamma = jnp.ones((cmid,), jnp.float32)
        beta = jnp.zeros((cmid,), jnp.float32)
        running_mean = jnp.zeros((cmid,), jnp.float32)
        running_var = jnp.ones((cmid,), jnp.float32)
        scale = gamma / jnp.sqrt(running_var + BN_EPS)
        bias = beta - running_mean * scale
        w2 = jax.random.normal(k2, (cmid, cout), jnp.float32) * 0.05
        b2 = jax.random.normal(k3, (cout,), jnp.float32) * 0.05
        params.append(dict(w1=w1, bn_scale=scale, bn_bias=bias, w2=w2, b2=b2))
    return params


def _ref_single_head_bf16(x_nhwc, p):
    """Pure-JAX reference mirroring the kernel's bf16-matmul / f32-accum math."""
    xb = x_nhwc.astype(jnp.bfloat16)
    w1b = p["w1"].astype(jnp.bfloat16)
    y = jax.lax.conv_general_dilated(
        xb, w1b, window_strides=(1, 1), padding="SAME",
        dimension_numbers=("NHWC", "HWIO", "NHWC"),
        preferred_element_type=jnp.float32)
    y = y * p["bn_scale"] + p["bn_bias"]
    y = jnp.where(y > 0, y, NEG_SLOPE * y).astype(jnp.bfloat16)
    z = jnp.einsum("nhwc,co->nhwo", y, p["w2"].astype(jnp.bfloat16),
                   preferred_element_type=jnp.float32) + p["b2"]
    return z


def _ref_single_head_f32(x_nhwc, p):
    """Full-precision reference (original module semantics)."""
    y = jax.lax.conv_general_dilated(
        x_nhwc, p["w1"], window_strides=(1, 1), padding="SAME",
        dimension_numbers=("NHWC", "HWIO", "NHWC"))
    y = y * p["bn_scale"] + p["bn_bias"]
    y = jnp.where(y > 0, y, NEG_SLOPE * y)
    z = jnp.einsum("nhwc,co->nhwo", y, p["w2"]) + p["b2"]
    return z


if __name__ == "__main__":
    num_classes = 3                      # out_channel = (3 + 5) * 3 = 24
    in_channels = (16, 8, 4)             # small stand-ins for (512, 256, 128)
    spatials = (4, 8, 16)                # yolo-style multi-scale feature maps
    batch = 2

    key = jax.random.PRNGKey(0)
    key, pkey = jax.random.split(key)
    params = init_yolo_head_params(pkey, num_classes, in_channels)

    feats = []
    for c, s in zip(in_channels, spatials):
        key, fk = jax.random.split(key)
        feats.append(jax.random.normal(fk, (batch, c, s, s), jnp.float32))  # NCHW
    feats = tuple(feats)

    outs = jax.block_until_ready(yolo_head_forward(feats, params))

    # Verify against pure-JAX references (NHWC), transposed back to NCHW.
    for x, p, o in zip(feats, params, outs):
        x_nhwc = jnp.transpose(x, (0, 2, 3, 1))
        ref_bf = jnp.transpose(_ref_single_head_bf16(x_nhwc, p), (0, 3, 1, 2))
        ref_fp = jnp.transpose(_ref_single_head_f32(x_nhwc, p), (0, 3, 1, 2))
        assert o.shape == ref_bf.shape, (o.shape, ref_bf.shape)
        # tight check vs. the bf16/f32-accum reference (same arithmetic)
        assert jnp.allclose(o, ref_bf, atol=2e-3, rtol=2e-3)
        # loose check vs. the original f32 module semantics (bf16 rounding only)
        assert jnp.allclose(o, ref_fp, atol=5e-2, rtol=5e-2)

    print("KERNEL_OK")
</pallas_src>

<mosaic_0001>
module attributes {stable_mosaic.version = 11 : i64} {
  func.func @_single_head_kernel(%arg0: i32, %arg1: i32, %arg2: memref<1x4x4x16xbf16, #tpu.memory_space<vmem>>, %arg3: memref<1x1x4x16xbf16, #tpu.memory_space<vmem>>, %arg4: memref<1x1x4x16xbf16, #tpu.memory_space<vmem>>, %arg5: memref<144x128xbf16, #tpu.memory_space<vmem>>, %arg6: memref<1x128xf32, #tpu.memory_space<vmem>>, %arg7: memref<1x128xf32, #tpu.memory_space<vmem>>, %arg8: memref<128x128xbf16, #tpu.memory_space<vmem>>, %arg9: memref<1x128xf32, #tpu.memory_space<vmem>>, %arg10: memref<1x16x128xf32, #tpu.memory_space<vmem>>, %arg11: memref<6x6x16xf32, #tpu.memory_space<vmem>>, %arg12: memref<16x144xf32, #tpu.memory_space<vmem>>) attributes {dimension_semantics = [#tpu.dimension_semantics<parallel>, #tpu.dimension_semantics<parallel>], iteration_bounds = array<i64: 1, 2>, scalar_prefetch = 0 : i64, scratch_operands = 2 : i64, tpu.core_type = #tpu.core_type<tc>, window_params = [{transform_indices = @transform_0, window_bounds = array<i64: 1, 4, 4, 16>}, {transform_indices = @transform_1, window_bounds = array<i64: 1, 1, 4, 16>}, {transform_indices = @transform_2, window_bounds = array<i64: 1, 1, 4, 16>}, {pipeline_mode = #tpu.pipeline_mode<synchronous>, transform_indices = @transform_3, window_bounds = array<i64: 144, 128>}, {pipeline_mode = #tpu.pipeline_mode<synchronous>, transform_indices = @transform_4, window_bounds = array<i64: 1, 128>}, {pipeline_mode = #tpu.pipeline_mode<synchronous>, transform_indices = @transform_5, window_bounds = array<i64: 1, 128>}, {pipeline_mode = #tpu.pipeline_mode<synchronous>, transform_indices = @transform_6, window_bounds = array<i64: 128, 128>}, {pipeline_mode = #tpu.pipeline_mode<synchronous>, transform_indices = @transform_7, window_bounds = array<i64: 1, 128>}, {transform_indices = @transform_8, window_bounds = array<i64: 1, 16, 128>}]} {
    %cst = arith.constant 0.000000e+00 : f32
    %0 = vector.broadcast %cst : f32 to vector<1x6x16xf32>
    %cst_0 = arith.constant 0.000000e+00 : f32
    %1 = vector.broadcast %cst_0 : f32 to vector<6x1x16xf32>
    %c0 = arith.constant 0 : index
    %c0_1 = arith.constant 0 : index
    %c0_2 = arith.constant 0 : index
    %2 = vector.load %arg11[%c0, %c0_1, %c0_2] : memref<6x6x16xf32, #tpu.memory_space<vmem>>, vector<1x6x16xf32>
    tpu.vector_store %arg11[%c0, %c0_1, %c0_2], %0 {strides = array<i32>} : memref<6x6x16xf32, #tpu.memory_space<vmem>>, vector<1x6x16xf32>,
    %c5 = arith.constant 5 : index
    %c0_3 = arith.constant 0 : index
    %c0_4 = arith.constant 0 : index
    %3 = vector.load %arg11[%c5, %c0_3, %c0_4] : memref<6x6x16xf32, #tpu.memory_space<vmem>>, vector<1x6x16xf32>
    tpu.vector_store %arg11[%c5, %c0_3, %c0_4], %0 {strides = array<i32>} : memref<6x6x16xf32, #tpu.memory_space<vmem>>, vector<1x6x16xf32>,
    %c0_5 = arith.constant 0 : index
    %c0_6 = arith.constant 0 : index
    %c0_7 = arith.constant 0 : index
    %4 = vector.load %arg11[%c0_5, %c0_6, %c0_7] : memref<6x6x16xf32, #tpu.memory_space<vmem>>, vector<6x1x16xf32>
    tpu.vector_store %arg11[%c0_5, %c0_6, %c0_7], %1 {strides = array<i32>} : memref<6x6x16xf32, #tpu.memory_space<vmem>>, vector<6x1x16xf32>,
    %c0_8 = arith.constant 0 : index
    %c5_9 = arith.constant 5 : index
    %c0_10 = arith.constant 0 : index
    %5 = vector.load %arg11[%c0_8, %c5_9, %c0_10] : memref<6x6x16xf32, #tpu.memory_space<vmem>>, vector<6x1x16xf32>
    tpu.vector_store %arg11[%c0_8, %c5_9, %c0_10], %1 {strides = array<i32>} : memref<6x6x16xf32, #tpu.memory_space<vmem>>, vector<6x1x16xf32>,
    %c0_11 = arith.constant 0 : index
    %c0_12 = arith.constant 0 : index
    %c0_13 = arith.constant 0 : index
    %c0_14 = arith.constant 0 : index
    %6 = vector.load %arg2[%c0_11, %c0_12, %c0_13, %c0_14] : memref<1x4x4x16xbf16, #tpu.memory_space<vmem>>, vector<1x4x4x16xbf16>
    %7 = vector.shape_cast %6 : vector<1x4x4x16xbf16> to vector<4x4x16xbf16>
    %8 = arith.extf %7 : vector<4x4x16xbf16> to vector<4x4x16xf32>
    %c1 = arith.constant 1 : index
    %c1_15 = arith.constant 1 : index
    %c0_16 = arith.constant 0 : index
    %9 = vector.load %arg11[%c1, %c1_15, %c0_16] : memref<6x6x16xf32, #tpu.memory_space<vmem>>, vector<4x4x16xf32>
    tpu.vector_store %arg11[%c1, %c1_15, %c0_16], %8 {strides = array<i32>} : memref<6x6x16xf32, #tpu.memory_space<vmem>>, vector<4x4x16xf32>,
    %c0_i32 = arith.constant 0 : i32
    %10 = arith.cmpi sgt, %arg0, %c0_i32 : i32
    %11 = arith.extui %10 : i1 to i32
    %c0_i32_17 = arith.constant 0 : i32
    %12 = arith.cmpi ne, %11, %c0_i32_17 : i32
    scf.if %12 {
      %c0_75 = arith.constant 0 : index
      %c0_76 = arith.constant 0 : index
      %c0_77 = arith.constant 0 : index
      %c0_78 = arith.constant 0 : index
      %73 = vector.load %arg3[%c0_75, %c0_76, %c0_77, %c0_78] : memref<1x1x4x16xbf16, #tpu.memory_space<vmem>>, vector<1x1x4x16xbf16>
      %74 = vector.shape_cast %73 : vector<1x1x4x16xbf16> to vector<1x4x16xbf16>
      %75 = arith.extf %74 : vector<1x4x16xbf16> to vector<1x4x16xf32>
      %c0_79 = arith.constant 0 : index
      %c1_80 = arith.constant 1 : index
      %c0_81 = arith.constant 0 : index
      %76 = vector.load %arg11[%c0_79, %c1_80, %c0_81] : memref<6x6x16xf32, #tpu.memory_space<vmem>>, vector<1x4x16xf32>
      tpu.vector_store %arg11[%c0_79, %c1_80, %c0_81], %75 {strides = array<i32>} : memref<6x6x16xf32, #tpu.memory_space<vmem>>, vector<1x4x16xf32>,
    } else {
    }
    %c0_i32_18 = arith.constant 0 : i32
    %13 = arith.cmpi slt, %arg0, %c0_i32_18 : i32
    %14 = arith.extui %13 : i1 to i32
    %c0_i32_19 = arith.constant 0 : i32
    %15 = arith.cmpi ne, %14, %c0_i32_19 : i32
    scf.if %15 {
      %c0_75 = arith.constant 0 : index
      %c0_76 = arith.constant 0 : index
      %c0_77 = arith.constant 0 : index
      %c0_78 = arith.constant 0 : index
      %73 = vector.load %arg4[%c0_75, %c0_76, %c0_77, %c0_78] : memref<1x1x4x16xbf16, #tpu.memory_space<vmem>>, vector<1x1x4x16xbf16>
      %74 = vector.shape_cast %73 : vector<1x1x4x16xbf16> to vector<1x4x16xbf16>
      %75 = arith.extf %74 : vector<1x4x16xbf16> to vector<1x4x16xf32>
      %c5_79 = arith.constant 5 : index
      %c1_80 = arith.constant 1 : index
      %c0_81 = arith.constant 0 : index
      %76 = vector.load %arg11[%c5_79, %c1_80, %c0_81] : memref<6x6x16xf32, #tpu.memory_space<vmem>>, vector<1x4x16xf32>
      tpu.vector_store %arg11[%c5_79, %c1_80, %c0_81], %75 {strides = array<i32>} : memref<6x6x16xf32, #tpu.memory_space<vmem>>, vector<1x4x16xf32>,
    } else {
    }
    %c0_20 = arith.constant 0 : index
    %c0_21 = arith.constant 0 : index
    %c0_22 = arith.constant 0 : index
    %16 = vector.load %arg11[%c0_20, %c0_21, %c0_22] : memref<6x6x16xf32, #tpu.memory_space<vmem>>, vector<4x4x16xf32>
    %17 = vector.shape_cast %16 : vector<4x4x16xf32> to vector<16x16xf32>
    %c0_23 = arith.constant 0 : index
    %c0_24 = arith.constant 0 : index
    %18 = vector.load %arg12[%c0_23, %c0_24] : memref<16x144xf32, #tpu.memory_space<vmem>>, vector<16x16xf32>
    tpu.vector_store %arg12[%c0_23, %c0_24], %17 {strides = array<i32>} : memref<16x144xf32, #tpu.memory_space<vmem>>, vector<16x16xf32>,
    %c0_25 = arith.constant 0 : index
    %c1_26 = arith.constant 1 : index
    %c0_27 = arith.constant 0 : index
    %19 = vector.load %arg11[%c0_25, %c1_26, %c0_27] : memref<6x6x16xf32, #tpu.memory_space<vmem>>, vector<4x4x16xf32>
    %20 = vector.shape_cast %19 : vector<4x4x16xf32> to vector<16x16xf32>
    %c0_28 = arith.constant 0 : index
    %c16 = arith.constant 16 : index
    %21 = vector.load %arg12[%c0_28, %c16] : memref<16x144xf32, #tpu.memory_space<vmem>>, vector<16x16xf32>
    tpu.vector_store %arg12[%c0_28, %c16], %20 {strides = array<i32>} : memref<16x144xf32, #tpu.memory_space<vmem>>, vector<16x16xf32>,
    %c0_29 = arith.constant 0 : index
    %c2 = arith.constant 2 : index
    %c0_30 = arith.constant 0 : index
    %22 = vector.load %arg11[%c0_29, %c2, %c0_30] : memref<6x6x16xf32, #tpu.memory_space<vmem>>, vector<4x4x16xf32>
    %23 = vector.shape_cast %22 : vector<4x4x16xf32> to vector<16x16xf32>
    %c0_31 = arith.constant 0 : index
    %c32 = arith.constant 32 : index
    %24 = vector.load %arg12[%c0_31, %c32] : memref<16x144xf32, #tpu.memory_space<vmem>>, vector<16x16xf32>
    tpu.vector_store %arg12[%c0_31, %c32], %23 {strides = array<i32>} : memref<16x144xf32, #tpu.memory_space<vmem>>, vector<16x16xf32>,
    %c1_32 = arith.constant 1 : index
    %c0_33 = arith.constant 0 : index
    %c0_34 = arith.constant 0 : index
    %25 = vector.load %arg11[%c1_32, %c0_33, %c0_34] : memref<6x6x16xf32, #tpu.memory_space<vmem>>, vector<4x4x16xf32>
    %26 = vector.shape_cast %25 : vector<4x4x16xf32> to vector<16x16xf32>
    %c0_35 = arith.constant 0 : index
    %c48 = arith.constant 48 : index
    %27 = vector.load %arg12[%c0_35, %c48] : memref<16x144xf32, #tpu.memory_space<vmem>>, vector<16x16xf32>
    tpu.vector_store %arg12[%c0_35, %c48], %26 {strides = array<i32>} : memref<16x144xf32, #tpu.memory_space<vmem>>, vector<16x16xf32>,
    %c1_36 = arith.constant 1 : index
    %c1_37 = arith.constant 1 : index
    %c0_38 = arith.constant 0 : index
    %28 = vector.load %arg11[%c1_36, %c1_37, %c0_38] : memref<6x6x16xf32, #tpu.memory_space<vmem>>, vector<4x4x16xf32>
    %29 = vector.shape_cast %28 : vector<4x4x16xf32> to vector<16x16xf32>
    %c0_39 = arith.constant 0 : index
    %c64 = arith.constant 64 : index
    %30 = vector.load %arg12[%c0_39, %c64] : memref<16x144xf32, #tpu.memory_space<vmem>>, vector<16x16xf32>
    tpu.vector_store %arg12[%c0_39, %c64], %29 {strides = array<i32>} : memref<16x144xf32, #tpu.memory_space<vmem>>, vector<16x16xf32>,
    %c1_40 = arith.constant 1 : index
    %c2_41 = arith.constant 2 : index
    %c0_42 = arith.constant 0 : index
    %31 = vector.load %arg11[%c1_40, %c2_41, %c0_42] : memref<6x6x16xf32, #tpu.memory_space<vmem>>, vector<4x4x16xf32>
    %32 = vector.shape_cast %31 : vector<4x4x16xf32> to vector<16x16xf32>
    %c0_43 = arith.constant 0 : index
    %c80 = arith.constant 80 : index
    %33 = vector.load %arg12[%c0_43, %c80] : memref<16x144xf32, #tpu.memory_space<vmem>>, vector<16x16xf32>
    tpu.vector_store %arg12[%c0_43, %c80], %32 {strides = array<i32>} : memref<16x144xf32, #tpu.memory_space<vmem>>, vector<16x16xf32>,
    %c2_44 = arith.constant 2 : index
    %c0_45 = arith.constant 0 : index
    %c0_46 = arith.constant 0 : index
    %34 = vector.load %arg11[%c2_44, %c0_45, %c0_46] : memref<6x6x16xf32, #tpu.memory_space<vmem>>, vector<4x4x16xf32>
    %35 = vector.shape_cast %34 : vector<4x4x16xf32> to vector<16x16xf32>
    %c0_47 = arith.constant 0 : index
    %c96 = arith.constant 96 : index
    %36 = vector.load %arg12[%c0_47, %c96] : memref<16x144xf32, #tpu.memory_space<vmem>>, vector<16x16xf32>
    tpu.vector_store %arg12[%c0_47, %c96], %35 {strides = array<i32>} : memref<16x144xf32, #tpu.memory_space<vmem>>, vector<16x16xf32>,
    %c2_48 = arith.constant 2 : index
    %c1_49 = arith.constant 1 : index
    %c0_50 = arith.constant 0 : index
    %37 = vector.load %arg11[%c2_48, %c1_49, %c0_50] : memref<6x6x16xf32, #tpu.memory_space<vmem>>, vector<4x4x16xf32>
    %38 = vector.shape_cast %37 : vector<4x4x16xf32> to vector<16x16xf32>
    %c0_51 = arith.constant 0 : index
    %c112 = arith.constant 112 : index
    %39 = vector.load %arg12[%c0_51, %c112] : memref<16x144xf32, #tpu.memory_space<vmem>>, vector<16x16xf32>
    tpu.vector_store %arg12[%c0_51, %c112], %38 {strides = array<i32>} : memref<16x144xf32, #tpu.memory_space<vmem>>, vector<16x16xf32>,
    %c2_52 = arith.constant 2 : index
    %c2_53 = arith.constant 2 : index
    %c0_54 = arith.constant 0 : index
    %40 = vector.load %arg11[%c2_52, %c2_53, %c0_54] : memref<6x6x16xf32, #tpu.memory_space<vmem>>, vector<4x4x16xf32>
    %41 = vector.shape_cast %40 : vector<4x4x16xf32> to vector<16x16xf32>
    %c0_55 = arith.constant 0 : index
    %c128 = arith.constant 128 : index
    %42 = vector.load %arg12[%c0_55, %c128] : memref<16x144xf32, #tpu.memory_space<vmem>>, vector<16x16xf32>
    tpu.vector_store %arg12[%c0_55, %c128], %41 {strides = array<i32>} : memref<16x144xf32, #tpu.memory_space<vmem>>, vector<16x16xf32>,
    %c0_56 = arith.constant 0 : index
    %c0_57 = arith.constant 0 : index
    %43 = vector.load %arg12[%c0_56, %c0_57] : memref<16x144xf32, #tpu.memory_space<vmem>>, vector<16x144xf32>
    %44 = arith.truncf %43 : vector<16x144xf32> to vector<16x144xbf16>
    %c0_58 = arith.constant 0 : index
    %c0_59 = arith.constant 0 : index
    %45 = vector.load %arg5[%c0_58, %c0_59] : memref<144x128xbf16, #tpu.memory_space<vmem>>, vector<144x128xbf16>
    %cst_60 = arith.constant dense<0.000000e+00> : vector<16x128xf32>
    %46 = tpu.matmul %44, %45, %cst_60 {dimension_numbers = #tpu.dot_dimension_numbers<[1], [0], [0], [1], [0, 0, 1, 1], [], []>} : vector<16x144xbf16>, vector<144x128xbf16>, vector<16x128xf32> -> vector<16x128xf32>
    %c0_61 = arith.constant 0 : index
    %c0_62 = arith.constant 0 : index
    %47 = vector.load %arg6[%c0_61, %c0_62] : memref<1x128xf32, #tpu.memory_space<vmem>>, vector<1x128xf32>
    %48 = vector.shape_cast %47 : vector<1x128xf32> to vector<128xf32>
    %49 = vector.shape_cast %48 : vector<128xf32> to vector<1x128xf32>
    %50 = vector.broadcast %49 : vector<1x128xf32> to vector<16x128xf32>
    %51 = arith.mulf %46, %50 : vector<16x128xf32>
    %c0_63 = arith.constant 0 : index
    %c0_64 = arith.constant 0 : index
    %52 = vector.load %arg7[%c0_63, %c0_64] : memref<1x128xf32, #tpu.memory_space<vmem>>, vector<1x128xf32>
    %53 = vector.shape_cast %52 : vector<1x128xf32> to vector<128xf32>
    %54 = vector.shape_cast %53 : vector<128xf32> to vector<1x128xf32>
    %55 = vector.broadcast %54 : vector<1x128xf32> to vector<16x128xf32>
    %56 = arith.addf %51, %55 : vector<16x128xf32>
    %cst_65 = arith.constant 0.000000e+00 : f32
    %57 = vector.broadcast %cst_65 : f32 to vector<16x128xf32>
    %58 = arith.cmpf ogt, %56, %57 : vector<16x128xf32>
    %cst_66 = arith.constant 1.000000e-01 : f32
    %59 = vector.broadcast %cst_66 : f32 to vector<16x128xf32>
    %60 = arith.mulf %59, %56 : vector<16x128xf32>
    %61 = arith.select %58, %56, %60 : vector<16x128xi1>, vector<16x128xf32>
    %62 = arith.truncf %61 : vector<16x128xf32> to vector<16x128xbf16>
    %c0_67 = arith.constant 0 : index
    %c0_68 = arith.constant 0 : index
    %63 = vector.load %arg8[%c0_67, %c0_68] : memref<128x128xbf16, #tpu.memory_space<vmem>>, vector<128x128xbf16>
    %cst_69 = arith.constant dense<0.000000e+00> : vector<16x128xf32>
    %64 = tpu.matmul %62, %63, %cst_69 {dimension_numbers = #tpu.dot_dimension_numbers<[1], [0], [0], [1], [0, 0, 1, 1], [], []>} : vector<16x128xbf16>, vector<128x128xbf16>, vector<16x128xf32> -> vector<16x128xf32>
    %c0_70 = arith.constant 0 : index
    %c0_71 = arith.constant 0 : index
    %65 = vector.load %arg9[%c0_70, %c0_71] : memref<1x128xf32, #tpu.memory_space<vmem>>, vector<1x128xf32>
    %66 = vector.shape_cast %65 : vector<1x128xf32> to vector<128xf32>
    %67 = vector.shape_cast %66 : vector<128xf32> to vector<1x128xf32>
    %68 = vector.broadcast %67 : vector<1x128xf32> to vector<16x128xf32>
    %69 = arith.addf %64, %68 : vector<16x128xf32>
    %c0_72 = arith.constant 0 : index
    %c0_73 = arith.constant 0 : index
    %c0_74 = arith.constant 0 : index
    %70 = vector.load %arg10[%c0_72, %c0_73, %c0_74] : memref<1x16x128xf32, #tpu.memory_space<vmem>>, vector<1x16x128xf32>
    %71 = vector.shape_cast %70 : vector<1x16x128xf32> to vector<16x128xf32>
    %72 = vector.shape_cast %69 : vector<16x128xf32> to vector<1x16x128xf32>
    tpu.vector_store %arg10[%c0_72, %c0_73, %c0_74], %72 {strides = array<i32>} : memref<1x16x128xf32, #tpu.memory_space<vmem>>, vector<1x16x128xf32>,
    return
  }
  func.func @transform_0(%arg0: i32, %arg1: i32) -> (i32, i32, i32, i32) {
    %c0_i32 = arith.constant 0 : i32
    %c0_i32_0 = arith.constant 0 : i32
    %c0_i32_1 = arith.constant 0 : i32
    return %arg1, %arg0, %c0_i32, %c0_i32_0 : i32, i32, i32, i32
  }
  func.func @transform_1(%arg0: i32, %arg1: i32) -> (i32, i32, i32, i32) {
    %c4_i32 = arith.constant 4 : i32
    %0 = arith.muli %arg0, %c4_i32 : i32
    %c1_i32 = arith.constant 1 : i32
    %1 = arith.subi %0, %c1_i32 : i32
    %c0_i32 = arith.constant 0 : i32
    %2 = arith.maxsi %1, %c0_i32 : i32
    %c0_i32_0 = arith.constant 0 : i32
    %c0_i32_1 = arith.constant 0 : i32
    %c0_i32_2 = arith.constant 0 : i32
    return %arg1, %2, %c0_i32_0, %c0_i32_1 : i32, i32, i32, i32
  }
  func.func @transform_2(%arg0: i32, %arg1: i32) -> (i32, i32, i32, i32) {
    %c1_i32 = arith.constant 1 : i32
    %0 = arith.addi %arg0, %c1_i32 : i32
    %c4_i32 = arith.constant 4 : i32
    %1 = arith.muli %0, %c4_i32 : i32
    %c3_i32 = arith.constant 3 : i32
    %2 = arith.minsi %1, %c3_i32 : i32
    %c0_i32 = arith.constant 0 : i32
    %c0_i32_0 = arith.constant 0 : i32
    %c0_i32_1 = arith.constant 0 : i32
    return %arg1, %2, %c0_i32, %c0_i32_0 : i32, i32, i32, i32
  }
  func.func @transform_3(%arg0: i32, %arg1: i32) -> (i32, i32) {
    %c0_i32 = arith.constant 0 : i32
    %c0_i32_0 = arith.constant 0 : i32
    %c0_i32_1 = arith.constant 0 : i32
    return %c0_i32, %c0_i32_0 : i32, i32
  }
  func.func @transform_4(%arg0: i32, %arg1: i32) -> (i32, i32) {
    %c0_i32 = arith.constant 0 : i32
    %c0_i32_0 = arith.constant 0 : i32
    %c0_i32_1 = arith.constant 0 : i32
    return %c0_i32, %c0_i32_0 : i32, i32
  }
  func.func @transform_5(%arg0: i32, %arg1: i32) -> (i32, i32) {
    %c0_i32 = arith.constant 0 : i32
    %c0_i32_0 = arith.constant 0 : i32
    %c0_i32_1 = arith.constant 0 : i32
    return %c0_i32, %c0_i32_0 : i32, i32
  }
  func.func @transform_6(%arg0: i32, %arg1: i32) -> (i32, i32) {
    %c0_i32 = arith.constant 0 : i32
    %c0_i32_0 = arith.constant 0 : i32
    %c0_i32_1 = arith.constant 0 : i32
    return %c0_i32, %c0_i32_0 : i32, i32
  }
  func.func @transform_7(%arg0: i32, %arg1: i32) -> (i32, i32) {
    %c0_i32 = arith.constant 0 : i32
    %c0_i32_0 = arith.constant 0 : i32
    %c0_i32_1 = arith.constant 0 : i32
    return %c0_i32, %c0_i32_0 : i32, i32
  }
  func.func @transform_8(%arg0: i32, %arg1: i32) -> (i32, i32, i32) {
    %c0_i32 = arith.constant 0 : i32
    %c0_i32_0 = arith.constant 0 : i32
    return %arg1, %arg0, %c0_i32 : i32, i32, i32
  }
}

</mosaic_0001>

<bundles_post_ra>
// kernel: tpu_custom_call.1
= control target key start
LH: loop header
LB: loop body
LE: loop exit
PB: predicated region body
PF: predicated region fallthrough
CT: control target
= control target key end

     0   :  { %s1943_s0 = inlined_call_operand.hbm [shape: bf16[2,4,4,16], index: 0, kind: input, shape index: {}]   ;;  %s1944_s1 = inlined_call_operand.hbm [shape: bf16[2,4,4,16], index: 1, kind: input, shape index: {}]   ;;  %s1945_s2 = inlined_call_operand.hbm [shape: bf16[2,4,4,16], index: 2, kind: input, shape index: {}]   ;;  %s1946_s3 = inlined_call_operand.hbm [shape: bf16[144,128], index: 3, kind: input, shape index: {}]   ;;  %s1947_s4 = inlined_call_operand.vmem [shape: f32[1,128], index: 4, kind: input, shape index: {}]   ;;  %s1948_s5 = inlined_call_operand.vmem [shape: f32[1,128], index: 5, kind: input, shape index: {}]   ;;  %s1949_s6 = inlined_call_operand.hbm [shape: bf16[128,128], index: 6, kind: input, shape index: {}]   ;;  %s1950_s7 = inlined_call_operand.vmem [shape: f32[1,128], index: 7, kind: input, shape index: {}]   ;;  %s1951_s8 = inlined_call_operand.hbm [shape: f32[2,16,128], index: 8, kind: output, shape index: {}]  }
   0x1   :  { %1969 = sst [smem:[#allocation26_spill]] %s1944_s1 }
   0x2   :  { %1970 = sst [smem:[#allocation27_spill]] %s1946_s3 }
   0x3   :  { %1971 = sst [smem:[#allocation28_spill]] %s1949_s6 }
   0x4   :  { %1972 = sst [smem:[#allocation29_spill]] %s1951_s8 }
   0x5   :  { %13 = vsyncpa [#allocation5], 0 }
   0x6   :  { %15 = vsyncpa [#allocation5 + $0x1], 0 }
   0x7   :  { %16 = vsyncpa [#allocation8], 0 }
   0x8   :  { %18 = vsyncpa [#allocation8 + $0x1], 0 }
   0x9   :  { %19 = vsyncpa [#allocation11], 0 }
   0xa   :  { %20 = vsyncpa [#allocation6], 0 }
   0xb   :  { %22 = vsyncpa [#allocation6 + $0x1], 0  ;;  %s1642_s27 = smov 0   ;;  %s1644_s28 = smov 0  }
   0xc   :  { %s1646_s29 = smov 0   ;;  %s1648_s30 = smov 0  }
   0xd   :  { %s1650_s9 = smov 0   ;;  %s1652_s10 = smov 0  }
   0xe LB: > { %1973 = sst [smem:[#allocation18_spill]] %s1553_s27  ;;  %s1673_s11 = sadd.s32 4294967295, %s1573_s10   ;;  %s1573_s10 = sphi %s1652_s10, %s28_s10   ;;  %s1569_s9 = sphi %s1650_s9, %s2012_s9   ;;  %s1565_s30 = sphi %s1648_s30, %s2011_s30   ;;  %s1561_s29 = sphi %s1646_s29, %s2010_s29   ;;  %s1557_s28 = sphi %s1644_s28, %s2014_s28   ;;  %s1553_s27 = sphi %s1642_s27, %s2013_s27  }
   0xf   : > { %1974 = sst [smem:[#allocation19_spill]] %s1561_s29  ;;  %s1124_s12 = sadd.s32 4294967294, %s1573_s10  }
  0x10   : > { %1975 = sst [smem:[#allocation20_spill]] %s1569_s9  ;;  %p62_p0 = scmp.ne.s32.totalorder %s1557_s28, %s1553_s27 }
  0x11   : > { %1976 = sst [smem:[#allocation21_spill]] %s1573_s10  ;;  %p1961_p1 = scmp.eq.s32.totalorder %s1673_s11, 0 }
  0x12   : > { %p271_p3 = scmp.eq.s32.totalorder %s1124_s12, 1  ;;  %p1125_p5 = scmp.ge.s32.totalorder %s1573_s10, 1 }
  0x13   : > { %p1682_p4 = por %p1961_p1, %p62_p0  ;;  %p278_p7 = scmp.lt.s32.totalorder %s1573_s10, 3 }
  0x14   : > { %p1687_p6 = por %p271_p3, %p62_p0  ;;  %s1575_s16 = smov [#allocation10]  }
  0x15   : > { %p1692_p8 = pnand %p1125_p5, %p278_p7  ;;  %s290_s17 = sshll.u32 %s1575_s16, 4  ;;  %s291_s17 = int_to_ptr.vmem [resolvable:$true] %s290_s17 }
  0x16   : > { %s1978_s14 = scalar_select %p1687_p6, 1, 0 }
  0x17   : > { %p1222_p9 = pneg %p1692_p8  ;;  %s37_s19 = sadd.s32 1, %s1569_s9 }
  0x18   : > { %1979 = sst [smem:[#allocation22_spill]] %s1978_s14  ;;  %s1360_s20 = scalar_lea.vmem %s291_s17, 1152 }
  0x19   : > { %p1701_p11 = pnand %p1222_p9, %p1961_p1  ;;  %p1361_p13 = scmp.ne.s32.totalorder %s291_s17, %s1360_s20 }
  0x1a   : > { %p1368_p5 = scmp.lt.s32.totalorder %s291_s17, %s291_s17  ;;  %p1369_p7 = scmp.lt.s32.totalorder %s1360_s20, %s1360_s20 }
  0x1b   : > { %p1962_p12 = pneg %p1701_p11 }
  0x1c   : > { %p1370_p2 = por %p1369_p7, %p1368_p5 }
  0x1d   : > { %p1363_p0 = pnand %p1361_p13, %p1962_p12 }
  0x1f   : > { %p1364_p3 = pneg %p1363_p0 }
  0x21   : > { %p1371_p10 = pnand %p1370_p2, %p1364_p3 }
  0x23   : > { %1374 = shalt.err (!%p1371_p10)
}
  0x24   : > { %s1952_s21 = smov 64   ;;  %s1953_s22 = smov 4  }
  0x25   : > { %s1982_s3 = sld [smem:[#allocation27_spill]]  ;;  %p38_p2 = scmp.ge.s32.totalorder %s37_s19, 2 }
  0x26   : > { %s49_s25 = sadd.s32 1, %s1561_s29  ;;  %p56_p9 = scmp.ne.s32.totalorder %s1561_s29, %s1557_s28 }
  0x27   : > { %p57_p10 = scmp.eq.s32.totalorder %s1573_s10, 0  ;;  %s2016_s19 = smov (%p38_p2, %s37_s19), 0 }
  0x28   : > { %1983 = sst [smem:[#allocation23_spill]] %s2016_s19  ;;  %p1984_p0 = scmp.eq.s32.totalorder %s1673_s11, 1 }
  0x29   : > { %p58_p13 = por %p57_p10, %p56_p9  ;;  %s44_s12 = ssub.s32 %s1569_s9, %s2016_s19 }
  0x2a   : > { %p1727_p3 = por %p1984_p0, %p56_p9  ;;  %p1245_p5 = scmp.lt.s32.totalorder %s1573_s10, 2 }
  0x2b   : > { %1225 = dma.hbm_to_vmem [thread:$0]  (!%p1701_p11), %s1982_s3, 1152, %s291_s17, [#allocation11], %s1952_s21, %s1952_s21, %s1953_s22  }
  0x2c   : > { %s1985_s26 = scalar_select %p1727_p3, 1, 0 }
  0x2d   : > { %p47_p7 = scmp.eq.s32.totalorder %s44_s12, 0  ;;  %s1735_s16 = sand.u32 1, %s1561_s29  }
  0x2e   : > { %1986 = sst [smem:[#allocation24_spill]] %s1985_s26  ;;  %s1738_s17 = sshll.u32 %s1569_s9, 7 }
  0x2f   : > { %p1740_p2 = pnand %p1245_p5, %p58_p13  ;;  %s349_s22 = sand.u32 1, %s1573_s10  }
  0x30   : > { %s1745_s23 = scalar_select %p47_p7, %s1561_s29, %s49_s25  }
  0x31   : > { %s1965_s3 = sshll.u32 %s1735_s16, 1  ;;  %s1989_s1 = sld [smem:[#allocation26_spill]] }
  0x32   : > { %1988 = sst [smem:[#allocation25_spill]] %s1745_s23  ;;  %s353_s27 = scalar_lea.vmem [#allocation7], %s1965_s3 }
  0x33   : > { %s366_s8 = sshll.u32 %s353_s27, 4  ;;  %s1759_s26 = scalar_lea.sflag [#allocation8], %s349_s22  ;;  %s367_s8 = int_to_ptr.vmem [resolvable:$true] %s366_s8 }
  0x34   : > { %p1963_p9 = pneg %p1740_p2  ;;  %s1388_s25 = scalar_lea.vmem %s367_s8, 32 }
  0x35   : > { %p1389_p10 = scmp.ne.s32.totalorder %s367_s8, %s1388_s25  ;;  %s1578_s21 = smov [#allocation7]  }
  0x36   : > { %s1393_s24 = sshll.u32 %s1578_s21, 4  ;;  %s1394_s24 = int_to_ptr.vmem [resolvable:$false] %s1393_s24 }
  0x37   : > { %s364_s9 = scalar_lea.hbm %s1989_s1, %s1738_s17  ;;  %p1391_p13 = pnand %p1389_p10, %p1963_p9 }
  0x38   : > { %s1395_s12 = scalar_lea.vmem %s1394_s24, 64  ;;  %p1396_p5 = scmp.lt.s32.totalorder %s367_s8, %s1394_s24 }
  0x39   : > { %p1392_p0 = pneg %p1391_p13  ;;  %p1397_p7 = scmp.lt.s32.totalorder %s1395_s12, %s1388_s25 }
  0x3b   : > { %p1398_p1 = por %p1397_p7, %p1396_p5 }
  0x3d   : > { %p1399_p12 = pnand %p1398_p1, %p1392_p0 }
  0x3f   : > { %1402 = shalt.err (!%p1399_p12)
}
  0x40   : > { %1235 = dma.hbm_to_vmem [thread:$0]  (!%p1740_p2), %s364_s9, 32, %s367_s8, %s1759_s26  }
  0x41   : > { %s1579_s27 = smov [#allocation12]   ;;  %s1129_s19 = sshll.u32 %s1735_s16, 3 }
  0x42   : > { %s309_s14 = sshll.u32 %s1579_s27, 4  ;;  %p1990_p13 = pneg %p1701_p11  ;;  %s310_s14 = int_to_ptr.vmem [resolvable:$true] %s309_s14 }
  0x43   : > { %s1414_s22 = scalar_lea.vmem %s310_s14, 1024  ;;  %p1422_p3 = scmp.lt.s32.totalorder %s310_s14, %s310_s14 }
  0x44   : > { %p1415_p10 = scmp.ne.s32.totalorder %s310_s14, %s1414_s22  ;;  %p1423_p5 = scmp.lt.s32.totalorder %s1414_s22, %s1414_s22 }
  0x46   : > { %p1417_p9 = pnand %p1415_p10, %p1990_p13  ;;  %p1424_p1 = por %p1423_p5, %p1422_p3 }
  0x48   : > { %p1418_p6 = pneg %p1417_p9 }
  0x4a   : > { %p1425_p12 = pnand %p1424_p1, %p1418_p6 }
  0x4c   : > { %1428 = shalt.err (!%p1425_p12)
}
  0x4d   : > { %s1991_s12 = smov 4   ;;  %s1992_s25 = smov 64  }
  0x4e   : > { %s1993_s6 = sld [smem:[#allocation28_spill]]  ;;  %s330_s21 = scalar_lea.vmem [#allocation4], %s1129_s19 }
  0x4f   : > { %s339_s24 = sshll.u32 %s330_s21, 4  ;;  %s327_s27 = scalar_lea.sflag [#allocation5], %s1735_s16  ;;  %s340_s24 = int_to_ptr.vmem [resolvable:$true] %s339_s24 }
  0x50   : > { %s1442_s3 = scalar_lea.vmem %s340_s24, 128  ;;  %p1994_p6 = pneg %p1740_p2 }
  0x51   : > { %p1443_p9 = scmp.ne.s32.totalorder %s340_s24, %s1442_s3  ;;  %s1580_s18 = smov [#allocation4]  }
  0x52   : > { %s1447_s22 = sshll.u32 %s1580_s18, 4  ;;  %s1448_s22 = int_to_ptr.vmem [resolvable:$false] %s1447_s22 }
  0x53   : > { %p1445_p3 = pnand %p1443_p9, %p1994_p6  ;;  %s1449_s1 = scalar_lea.vmem %s1448_s22, 256 }
  0x54   : > { %1228 = dma.hbm_to_vmem [thread:$0]  (!%p1701_p11), %s1993_s6, 1024, %s310_s14, [#allocation11], %s1992_s25, %s1992_s25, %s1991_s12  }
  0x55   : > { %p1446_p0 = pneg %p1445_p3  ;;  %p1450_p7 = scmp.lt.s32.totalorder %s340_s24, %s1448_s22 }
  0x56   : > { %p1451_p10 = scmp.lt.s32.totalorder %s1449_s1, %s1442_s3 }
  0x58   : > { %p1452_p13 = por %p1451_p10, %p1450_p7 }
  0x5a   : > { %p1453_p5 = pnand %p1452_p13, %p1446_p0 }
  0x5c   : > { %1456 = shalt.err (!%p1453_p5)
}
  0x5d   : > { %s1581_s14 = smov 32   ;;  %s1582_s19 = smov 2  }
  0x5e   : > { %s1995_s8 = scalar_lea.hbm %s1943_s0, %s1738_s17  ;;  %s1174_s9 = sadd.s32 96, %s1738_s17 }
  0x5f   : > { %1232 = dma.hbm_to_vmem [thread:$0]  (!%p1740_p2), %s1995_s8, 128, %s340_s24, %s327_s27, %s1581_s14, %s1581_s14, %s1582_s19  }
  0x60   : > { %s1996_s21 = sshll.u32 %s1735_s16, 1  ;;  %s388_s6 = scalar_lea.hbm %s1945_s2, %s1174_s9 }
  0x61   : > { %s377_s18 = scalar_lea.vmem [#allocation9], %s1996_s21  ;;  %p1997_p1 = pmov %p1994_p6 }
  0x62   : > { %s390_s1 = sshll.u32 %s377_s18, 4  ;;  %s1583_s29 = smov [#allocation9]   ;;  %s391_s1 = int_to_ptr.vmem [resolvable:$true] %s390_s1 }
  0x63   : > { %s1470_s23 = scalar_lea.vmem %s391_s1, 32  ;;  %s1475_s10 = sshll.u32 %s1583_s29, 4  ;;  %s1476_s10 = int_to_ptr.vmem [resolvable:$false] %s1475_s10 }
  0x64   : > { %p1471_p11 = scmp.ne.s32.totalorder %s391_s1, %s1470_s23  ;;  %s1477_s12 = scalar_lea.vmem %s1476_s10, 64 }
  0x65   : > { %p1478_p6 = scmp.lt.s32.totalorder %s391_s1, %s1476_s10  ;;  %p1479_p3 = scmp.lt.s32.totalorder %s1477_s12, %s1470_s23 }
  0x66   : > { %p1473_p12 = pnand %p1471_p11, %p1997_p1 }
  0x67   : > { %p1480_p0 = por %p1479_p3, %p1478_p6 }
  0x68   : > { %p1474_p9 = pneg %p1473_p12 }
  0x6a   : > { %p1481_p7 = pnand %p1480_p0, %p1474_p9 }
  0x6c   : > { %1484 = shalt.err (!%p1481_p7)
}
  0x6d   : > { %1238 = dma.hbm_to_vmem [thread:$0]  (!%p1740_p2), %s388_s6, 32, %s391_s1, %s1759_s26  }
  0x6e   : > { %399 = sbr.rel (%p1692_p8) target bundleno = 708 (0x2c4), region = 52  ;;  %s1807_s16 = sand.u32 (!%p1692_p8), 1, %s1557_s28  }
  0x6f   : > { %s1139_s29 = sshll.u32 (!%p1692_p8), %s1807_s16, 3  ;;  %s402_s17 = scalar_lea.sflag (!%p1692_p8), [#allocation5], %s1807_s16 }
  0x70   : > { %s1811_s10 = scalar_lea.vmem (!%p1692_p8), [#allocation4], %s1139_s29 }
  0x73   : > { %1536 = dma.done.wait (%p1682_p4), %s402_s17, 128  }
  0x74   : > { %1538 = vsyncadd (%p1682_p4), %s402_s17, 4294967168  ;;  %s410_s6 = sand.u32 1, %s1673_s11  }
  0x75   : > { %s411_s15 = scalar_lea.sflag [#allocation8], %s410_s6 }
  0x76   : > { %1540 = dma.done.wait (%p1682_p4), %s411_s15, 64  }
  0x77   : > { %1542 = vsyncadd (%p1682_p4), %s411_s15, 4294967232  ;;  %p1998_p8 = scmp.eq.s32.totalorder %s1673_s11, 0 }
  0x79   : > { %1544 = dma.done.wait (%p1998_p8), [#allocation11], 2176   ;;  %p1999_p2 = pmov %p1998_p8 }
  0x7a   : > { %vm485_vm0 = vcmask 128000   ;;  %vm489_vm1 = vcmask 122880   ;;  %v1584_v0 = vmov 0.0   ;;  %v1585_v1 = vmov 0   ;;  %v502_v2 = vld [vmem:[%s1811_s10] sm:$0x3] }
  0x7b   : > { %1546 = vsyncadd (%p1999_p2), [#allocation11], 4294965120  ;;  %486 = vst.msk [vmem:[#allocation2] sm:$0x3f] %vm485_vm0, %v1584_v0  ;;  %1186 = vmatprep.subr.bf16.mxu1 %v1584_v0  ;;  %774 = vmatprep.subr.bf16.mxu0 %v1585_v1  ;;  %vm511_vm2 = vcmask 125952   ;;  %v506_v5 = vunpack.c.l.bf16 %v502_v2  ;;  %v1329_v10 = vld [vmem:[#allocation10 + $0x38] sm:$0xff]  }
  0x7c   : > { %488 = vst.msk [vmem:[#allocation2 + $0x28] sm:$0x3f] %vm485_vm0, %v1584_v0  ;;  %v503_v3 = vld [vmem:[%s1811_s10 + $0x2] sm:$0x3]  ;;  %v504_v4 = vld [vmem:[%s1811_s10 + $0x4] sm:$0x3]  ;;  %775 = vmatpush1.bf16.msra.mxu0 %v1329_v10 }
  0x7d   : > { %491 = vst.msk [vmem:[#allocation2 + $0x8] sm:$0x1] %vm489_vm1, %v1584_v0  ;;  %492 = vst.msk [vmem:[#allocation2 + $0x10] sm:$0x1] %vm489_vm1, %v1584_v0  ;;  %v507_v6 = vunpack.c.l.bf16 %v503_v3  ;;  %v508_v7 = vunpack.c.l.bf16 %v504_v4  ;;  %v505_v8 = vld [vmem:[%s1811_s10 + $0x6] sm:$0x3]  ;;  %776 = vmatprep.subr.bf16.mxu0 %v1585_v1 }
  0x7e   : > { %493 = vst.msk [vmem:[#allocation2 + $0x18] sm:$0x1] %vm489_vm1, %v1584_v0  ;;  %494 = vst.msk [vmem:[#allocation2 + $0x20] sm:$0x1] %vm489_vm1, %v1584_v0  ;;  %v509_v9 = vunpack.c.l.bf16 %v505_v8  ;;  %v1332_v11 = vld [vmem:[#allocation10 + $0x30] sm:$0xff]   ;;  %v1334_v12 = vld [vmem:[#allocation10 + $0x28] sm:$0xff]  }
  0x7f   : > { %497 = vst.msk [vmem:[#allocation2 + $0xd] sm:$0x1] %vm489_vm1, %v1584_v0  ;;  %498 = vst.msk [vmem:[#allocation2 + $0x15] sm:$0x1] %vm489_vm1, %v1584_v0  ;;  %v1335_v15 = vld [vmem:[#allocation10 + $0x20] sm:$0xff]   ;;  %s1586_s11 = smov 16  }
  0x80   : > { %499 = vst.msk [vmem:[#allocation2 + $0x1d] sm:$0x1] %vm489_vm1, %v1584_v0  ;;  %500 = vst.msk [vmem:[#allocation2 + $0x25] sm:$0x1] %vm489_vm1, %v1584_v0  ;;  %777 = vmatpush1.bf16.msra.mxu0 %v1332_v11  ;;  %s1587_s13 = smov 32   ;;  %vm542_vm3 = vcmask 130048  }
  0x81   : > { %490 = vst.msk [vmem:[#allocation2] sm:$0x1] %vm489_vm1, %v1584_v0  ;;  %496 = vst.msk [vmem:[#allocation2 + $0x5] sm:$0x1] %vm489_vm1, %v1584_v0  ;;  %778 = vmatprep.subr.bf16.mxu0 %v1585_v1  ;;  %s1588_s26 = smov 48   ;;  %s1589_s20 = smov 64  }
  0x82   : > { %495 = vst.msk [vmem:[#allocation2 + $0x28] sm:$0x1] %vm489_vm1, %v1584_v0  ;;  %501 = vst.msk [vmem:[#allocation2 + $0x2d] sm:$0x1] %vm489_vm1, %v1584_v0  ;;  %v1336_v30 = vld [vmem:[#allocation10 + $0x18] sm:$0xff]   ;;  %v1337_v33 = vld [vmem:[#allocation10 + $0x10] sm:$0xff]  }
  0x83   : > { %512 = vst.msk [vmem:[#allocation2 + $0x9] sm:$0xf] %vm511_vm2, %v506_v5  ;;  %513 = vst.msk [vmem:[#allocation2 + $0x11] sm:$0xf] %vm511_vm2, %v507_v6  ;;  %s1590_s23 = smov 80   ;;  %v1338_v34 = vld [vmem:[#allocation10 + $0x8] sm:$0xff]  }
  0x84   : > { %514 = vst.msk [vmem:[#allocation2 + $0x19] sm:$0xf] %vm511_vm2, %v508_v7  ;;  %515 = vst.msk [vmem:[#allocation2 + $0x21] sm:$0xf] %vm511_vm2, %v509_v9  ;;  %779 = vmatpush1.bf16.msra.mxu0 %v1334_v12  ;;  %s1591_s24 = smov 96   ;;  %v1341_v40 = vld [vmem:[#allocation12 + $0x38] sm:$0xff]  }
  0x85   : > { %780 = vmatprep.subr.bf16.mxu0 %v1585_v1  ;;  %v1339_v41 = vld [vmem:[#allocation10] sm:$0xff]   ;;  %s1592_s27 = smov 112   ;;  %1187 = vmatpush3.bf16.msra.mxu1 %v1341_v40  ;;  %v1342_v42 = vld [vmem:[#allocation12 + $0x30] sm:$0xff]   ;;  %v1343_v44 = vld [vmem:[#allocation12 + $0x28] sm:$0xff]   ;;  %vm561_vm4 = vcmask 261248   ;;  %vm580_vm5 = vcmask 392448  }
  0x86   : > { %v1340_v43 = vld [vmem:[#allocation10 + $0x40] sm:$0xff]   ;;  %1188 = vmatprep.subr.bf16.mxu1 %v1584_v0  ;;  %v1344_v45 = vld [vmem:[#allocation12 + $0x20] sm:$0xff]   ;;  %vm599_vm6 = vcmask 523648   ;;  %vm618_vm7 = vcmask 654848   ;;  %vm637_vm8 = vcmask 786048   ;;  %vm657_vm9 = vcmask 917248  }
  0x87   : > { %v1345_v46 = vld [vmem:[#allocation12 + $0x18] sm:$0xff]   ;;  %vm676_vm10 = vcmask 1048448   ;;  %v1347_v2 = vld [vmem:[#allocation12 + $0x8] sm:$0xff]   ;;  %v1348_v3 = vld [vmem:[#allocation12] sm:$0xff]   ;;  %vm1593_vm11 = vmmov 0   ;;  %s1144_s9 = sshll.u32 %s1807_s16, 4 }
  0x88   : > { %781 = vmatpush1.bf16.msra.mxu0 %v1335_v15  ;;  %v530_v21 = vld [vmem:[#allocation2] sm:$0xf]  ;;  %1202 = vmatprep.mubr.msk.bf16.mxu1 %vm1593_vm11, %v1584_v0  ;;  %s2000_s1 = sld [smem:[#allocation24_spill]]  ;;  %s473_s3 = scalar_lea.vmem [#allocation13], %s1144_s9 }
  0x89   : > { %782 = vmatprep.subr.bf16.mxu0 %v1585_v1  ;;  %1189 = vmatpush3.bf16.msra.mxu1 %v1342_v42  ;;  %v1155_v4 = vld [vmem:[%s1947_s4] ss:$0 sm:$0xff]  ;;  %s970_s22 = sshll.u32 %s473_s3, 4  ;;  %s1175_s12 = sshll.u32 %s1565_s30, 8  ;;  %s1890_s22 = int_to_ptr.vmem [resolvable:$true] %s970_s22 }
  0x8a   : > { %v1315_v13 = vld [vmem:[#allocation2 + $0x1] ss:$8 sps:$4 sm:$0xff]   ;;  %1190 = vmatprep.subr.bf16.mxu1 %v1584_v0  ;;  %v1156_v6 = vld [vmem:[%s1948_s5] ss:$0 sm:$0xff]  ;;  %s2001_s10 = sld [smem:[#allocation29_spill]]  ;;  %s1594_s30 = smov [#allocation13]  }
  0x8b   : > { %v1316_v14 = vld [vmem:[#allocation2 + $0x2] ss:$8 sps:$4 sm:$0xff]   ;;  %555 = vrot.lane.b32.xlu0 %v1315_v13, %s1586_s11  ;;  %v1317_v16 = vld [vmem:[#allocation2 + $0x11] ss:$8 sps:$4 sm:$0xff]  }
  0x8c   : > { %574 = vrot.lane.b32.xlu1 %v1316_v14, %s1587_s13  ;;  %v1318_v17 = vld [vmem:[#allocation2 + $0x12] ss:$8 sps:$4 sm:$0xff]   ;;  %v531_v24 = vld [vmem:[#allocation2 + $0x8] sm:$0xf]  ;;  %783 = vmatpush1.bf16.msra.mxu0 %v1336_v30 }
  0x8d   : > { %v1319_v18 = vld [vmem:[#allocation2 + $0x8] ss:$8 sps:$4 sm:$0xff]   ;;  %v1320_v19 = vld [vmem:[#allocation2 + $0x18] ss:$8 sps:$4 sm:$0xff]   ;;  %v538_v26 = vcombine.low %v530_v21, %v531_v24  ;;  %784 = vmatprep.subr.bf16.mxu0 %v1585_v1  ;;  %1191 = vmatpush3.bf16.msra.mxu1 %v1343_v44 }
  0x8e   : > { %v1321_v20 = vld [vmem:[#allocation2 + $0x9] ss:$8 sps:$4 sm:$0xff]   ;;  %v1322_v22 = vld [vmem:[#allocation2 + $0x19] ss:$8 sps:$4 sm:$0xff]   ;;  %1192 = vmatprep.subr.bf16.mxu1 %v1584_v0  ;;  %p2003_p10 = scmp.ne.s32.totalorder %s2000_s1, 0 }
  0x8f   : > { %557 = vrot.lane.b32.xlu0 %v1317_v16, %s1586_s11  ;;  %v1323_v23 = vld [vmem:[#allocation2 + $0xa] ss:$8 sps:$4 sm:$0xff]   ;;  %v1324_v25 = vld [vmem:[#allocation2 + $0x1a] ss:$8 sps:$4 sm:$0xff]   ;;  %543 = vst.msk [vmem:[#allocation3] sm:$0xff] %vm542_vm3, %v538_v26  ;;  %s955_s11 = scalar_lea.sflag [#allocation6], %s1807_s16 }
  0x90   : > { %576 = vrot.lane.b32.xlu1 %v1318_v17, %s1587_s13  ;;  %v1330_v27 = vld [vmem:[#allocation2 + $0x12] ss:$8 sps:$4 sm:$0xff]   ;;  %v1331_v28 = vld [vmem:[#allocation2 + $0x22] ss:$8 sps:$4 sm:$0xff]   ;;  %785 = vmatpush1.bf16.msra.mxu0 %v1337_v33  ;;  %s2002_s6 = smov %s2001_s10  ;;  %s1895_s15 = scalar_lea.hbm %s2001_s10, %s1175_s12 }
  0x91   : > { %v1333_v29 = vld [vmem:[#allocation2 + $0x10] ss:$8 sps:$4 sm:$0xff]   ;;  %691 = vst.msk [vmem:[#allocation3 + $0x8] sm:$0xff] %vm542_vm3, %v1330_v27  ;;  %692 = vst.msk [vmem:[#allocation3 + $0x18] sm:$0xff] %vm542_vm3, %v1331_v28  ;;  %v1326_v32 = vld [vmem:[#allocation2 + $0x20] ss:$8 sps:$4 sm:$0xff]   ;;  %786 = vmatprep.subr.bf16.mxu0 %v1585_v1  ;;  %1193 = vmatpush3.bf16.msra.mxu1 %v1344_v45 }
  0x92   : > { %v1325_v31 = vld [vmem:[#allocation2 + $0x10] ss:$8 sps:$4 sm:$0xff]   ;;  %544 = vst.msk [vmem:[#allocation3 + $0x10] sm:$0xff] %vm542_vm3, %v1333_v29  ;;  %v1328_v36 = vld [vmem:[#allocation2 + $0x21] ss:$8 sps:$4 sm:$0xff]   ;;  %1194 = vmatprep.subr.bf16.mxu1 %v1584_v0  ;;  %s1485_s13 = scalar_lea.vmem %s1890_s22, 256 }
  0x93   : > { %593 = vrot.lane.b32.xlu0 %v1319_v18, %s1588_s26  ;;  %v1327_v35 = vld [vmem:[#allocation2 + $0x11] ss:$8 sps:$4 sm:$0xff]   ;;  %v1157_v18 = vld [vmem:[%s1950_s7] ss:$0 sm:$0xff]  ;;  %p1486_p4 = scmp.ne.s32.totalorder %s1890_s22, %s1485_s13 }
  0x94   : > { %595 = vrot.lane.b32.xlu1 %v1320_v19, %s1588_s26  ;;  %787 = vmatpush1.bf16.msra.mxu0 %v1338_v34  ;;  %s1489_s26 = sshll.u32 %s1594_s30, 4  ;;  %s1490_s26 = int_to_ptr.vmem [resolvable:$false] %s1489_s26 }
  0x95   : > { %788 = vmatprep.subr.bf16.mxu0 %v1585_v1  ;;  %1195 = vmatpush3.bf16.msra.mxu1 %v1345_v46  ;;  %p1487_p13 = pnand %p1486_p4, %p2003_p10  ;;  %p1492_p11 = scmp.lt.s32.totalorder %s1890_s22, %s1490_s26 }
  0x96   : > { %1196 = vmatprep.subr.bf16.mxu1 %v1584_v0 }
  0x97   : > { %612 = vrot.lane.b32.xlu0 %v1321_v20, %s1589_s20  ;;  %p1488_p5 = pneg %p1487_p13 }
  0x98   : > { %614 = vrot.lane.b32.xlu1 %v1322_v22, %s1589_s20  ;;  %v694_v37 = vld [vmem:[#allocation3 + $0x8] sm:$0xff]  ;;  %v696_v38 = vld [vmem:[#allocation3 + $0x18] sm:$0xff]  ;;  %789 = vmatpush1.bf16.msra.mxu0 %v1339_v41  ;;  %s1491_s20 = scalar_lea.vmem %s1490_s26, 512 }
  0x99   : > { %v698_v39 = vpack.c.bf16 %v696_v38, %v694_v37  ;;  %804 = vmatprep.subr.bf16.mxu0 %v1585_v1  ;;  %v1346_v1 = vld [vmem:[#allocation12 + $0x10] sm:$0xff]   ;;  %p1493_p1 = scmp.lt.s32.totalorder %s1491_s20, %s1485_s13 }
  0x9a   : > { %1197 = vmatpush3.bf16.msra.mxu1 %v1346_v1 }
  0x9b   : > { %631 = vrot.lane.b32.xlu0 %v1323_v23, %s1590_s23  ;;  %1154 = vmatprep.mubr.msk.bf16.mxu0 %vm542_vm3, %v698_v39  ;;  %p1494_p12 = por %p1493_p1, %p1492_p11 }
  0x9c   : > { %633 = vrot.lane.b32.xlu1 %v1324_v25, %s1590_s23  ;;  %805 = vmatpush2.bf16.msra.mxu0 %v1340_v43 }
  0x9d   : > { %1198 = vmatprep.subr.bf16.mxu1 %v1584_v0  ;;  %p1495_p9 = pnand %p1494_p12, %p1488_p5 }
  0x9e   : > { %1199 = vmatpush3.bf16.msra.mxu1 %v1347_v2 }
  0x9f   : > { %651 = vrot.lane.b32.xlu0 %v1325_v31, %s1591_s24  ;;  %1200 = vmatprep.subr.bf16.mxu1 %v1584_v0 }
  0xa0   : > { %653 = vrot.lane.b32.xlu1 %v1326_v32, %s1591_s24 }
  0xa2   : > { %1201 = vmatpush3.bf16.msra.mxu1 %v1348_v3 }
  0xa3   : > { %670 = vrot.lane.b32.xlu0 %v1327_v35, %s1592_s27 }
  0xa4   : > { %672 = vrot.lane.b32.xlu1 %v1328_v36, %s1592_s27 }
  0xfd   : > { %v556_v47 = vpop.permute.xlu0 %555 }
  0xfe   : > { %562 = vst.msk [vmem:[#allocation3] sm:$0xff] %vm561_vm4, %v556_v47  ;;  %v575_v48 = vpop.permute.xlu1 %574 }
  0xff   : > { %581 = vst.msk [vmem:[#allocation3] sm:$0xff] %vm580_vm5, %v575_v48 }
 0x101   : > { %v558_v49 = vpop.permute.xlu0 %557 }
 0x102   : > { %563 = vst.msk [vmem:[#allocation3 + $0x10] sm:$0xff] %vm561_vm4, %v558_v49  ;;  %v577_v50 = vpop.permute.xlu1 %576 }
 0x103   : > { %582 = vst.msk [vmem:[#allocation3 + $0x10] sm:$0xff] %vm580_vm5, %v577_v50 }
 0x105   : > { %v594_v51 = vpop.permute.xlu0 %593 }
 0x106   : > { %600 = vst.msk [vmem:[#allocation3] sm:$0xff] %vm599_vm6, %v594_v51  ;;  %v596_v52 = vpop.permute.xlu1 %595 }
 0x107   : > { %601 = vst.msk [vmem:[#allocation3 + $0x10] sm:$0xff] %vm599_vm6, %v596_v52 }
 0x109   : > { %v613_v53 = vpop.permute.xlu0 %612 }
 0x10a   : > { %619 = vst.msk [vmem:[#allocation3] sm:$0xff] %vm618_vm7, %v613_v53  ;;  %v615_v54 = vpop.permute.xlu1 %614 }
 0x10b   : > { %620 = vst.msk [vmem:[#allocation3 + $0x10] sm:$0xff] %vm618_vm7, %v615_v54 }
 0x10d   : > { %v632_v55 = vpop.permute.xlu0 %631 }
 0x10e   : > { %638 = vst.msk [vmem:[#allocation3] sm:$0xff] %vm637_vm8, %v632_v55  ;;  %v634_v56 = vpop.permute.xlu1 %633 }
 0x10f   : > { %639 = vst.msk [vmem:[#allocation3 + $0x10] sm:$0xff] %vm637_vm8, %v634_v56 }
 0x111   : > { %v652_v57 = vpop.permute.xlu0 %651 }
 0x112   : > { %658 = vst.msk [vmem:[#allocation3] sm:$0xff] %vm657_vm9, %v652_v57  ;;  %v654_v58 = vpop.permute.xlu1 %653 }
 0x113   : > { %659 = vst.msk [vmem:[#allocation3 + $0x10] sm:$0xff] %vm657_vm9, %v654_v58 }
 0x115   : > { %v671_v59 = vpop.permute.xlu0 %670 }
 0x116   : > { %677 = vst.msk [vmem:[#allocation3] sm:$0xff] %vm676_vm10, %v671_v59  ;;  %v673_v60 = vpop.permute.xlu1 %672 }
 0x117   : > { %678 = vst.msk [vmem:[#allocation3 + $0x10] sm:$0xff] %vm676_vm10, %v673_v60 }
 0x11d   : > { %v693_v61 = vld [vmem:[#allocation3] sm:$0xff] }
 0x11e   : > { %v695_v62 = vld [vmem:[#allocation3 + $0x10] sm:$0xff] }
 0x11f   : > { %v697_v63 = vpack.c.bf16 %v695_v62, %v693_v61 }
 0x121   : > { %807 = vmatmul.mubr.bf16.vlgmr.msra.gmra.mxu0 %v697_v63 }
 0x1e1   : > { %v808_v5 = vpop.f32.mrf.mxu0 }
 0x1e2   : > { %v822_v7 = vmul.f32 %v1155_v4, %v808_v5 }
 0x1e3   : > { %v810_v8 = vpop.f32.mrf.mxu0 }
 0x1e4   : > { %v831_v9 = vadd.f32 %v1156_v6, %v822_v7 }
 0x1e5   : > { %v811_v10 = vpop.f32.mrf.mxu0 }
 0x1e6   : > { %v823_v11 = vmul.f32 %v1155_v4, %v811_v10  ;;  %v835_v13 = vmul.f32 0.1, %v831_v9  ;;  %vm833_vm12 = vcmp.gt.f32.partialorder %v831_v9, 0.0 }
 0x1e7   : > { %v813_v12 = vpop.f32.mrf.mxu0 }
 0x1e8   : > { %v832_v0 = vadd.f32 %v1156_v6, %v823_v11  ;;  %v837_v15 = vsel %vm833_vm12, %v831_v9, %v835_v13 }
 0x1ea   : > { %vm834_vm13 = vcmp.gt.f32.partialorder %v832_v0, 0.0  ;;  %v836_v14 = vmul.f32 0.1, %v832_v0 }
 0x1ec   : > { %v838_v16 = vsel %vm834_vm13, %v832_v0, %v836_v14 }
 0x1ed   : > { %v839_v17 = vpack.c.bf16 %v838_v16, %v837_v15 }
 0x1ef   : > { %1203 = vmatmul.mubr.bf16.vlgmr.msra.gmra.mxu1 %v839_v17 }
 0x2af   : > { %v945_v19 = vpop.f32.mrf.mxu1 }
 0x2b0   : > { %v946_v20 = vadd.f32 %v1157_v18, %v945_v19 }
 0x2b1   : > { %v1204_v21 = vpop.f32.mrf.mxu1 }
 0x2b2   : > { %952 = vst [vmem:[%s473_s3] sm:$0xff] %v946_v20 }
 0x2b3   : > { %v948_v22 = vpop.f32.mrf.mxu1 }
 0x2b4   : > { %v949_v23 = vadd.f32 %v1157_v18, %v948_v22 }
 0x2b5   : > { %v1205_v24 = vpop.f32.mrf.mxu1 }
 0x2b6   : > { %953 = vst [vmem:[%s473_s3 + $0x8] sm:$0xff] %v949_v23 }
 0x2b7   : > { %1498 = shalt.err (!%p1495_p9)
}
 0x2b8   : > { %s1499_s23 = scalar_lea.hbm %s1895_s15, 256  ;;  %s1503_s14 = scalar_lea.hbm %s2002_s6, 512 }
 0x2b9   : > { %p1500_p6 = scmp.ne.s32.totalorder %s1895_s15, %s1499_s23  ;;  %p1504_p7 = scmp.lt.s32.totalorder %s1895_s15, %s2002_s6 }
 0x2ba   : > { %p1505_p8 = scmp.lt.s32.totalorder %s1503_s14, %s1499_s23 }
 0x2bb   : > { %p1501_p3 = pnand %p1500_p6, %p2003_p10 }
 0x2bc   : > { %p1506_p2 = por %p1505_p8, %p1504_p7 }
 0x2bd   : > { %p1502_p0 = pneg %p1501_p3 }
 0x2bf   : > { %p1507_p4 = pnand %p1506_p2, %p1502_p0 }
 0x2c1   : > { %1510 = shalt.err (!%p1507_p4)
}
 0x2c2   : > { %s1595_s8 = smov 128   ;;  %s1596_s9 = smov 8  }
 0x2c3   : > { %1220 = dma.vmem_to_hbm [thread:$0]  (%p2003_p10), %s1890_s22, 256, %s1895_s15, %s955_s11, %s1595_s8, %s1595_s8, %s1596_s9  }
 0x2c4 PF: > { %s2004_s21 = sld [smem:[#allocation18_spill]] }
 0x2c5   : > { %s2005_s18 = sld [smem:[#allocation22_spill]] }
 0x2c6   : > { %s2006_s3 = sld [smem:[#allocation21_spill]] }
 0x2ca   : > { %s985_s12 = sand.u32 1, %s2004_s21  }
 0x2cb   : > { %p2007_p13 = scmp.ne.s32.totalorder %s2005_s18, 0  ;;  %s986_s29 = scalar_lea.sflag [#allocation6], %s985_s12 }
 0x2cc   : > { %p2008_p5 = scmp.ge.s32.totalorder %s2006_s3, 2 }
 0x2ce   : > { %p1240_p11 = pnand %p2008_p5, %p2007_p13 }
 0x2d0   : > { %p1241_p1 = pneg %p1240_p11 }
 0x2d2   : > { %1548 = dma.done.wait (%p1241_p1), %s986_s29, 256  }
 0x2d3   : > { %1550 = vsyncadd (%p1241_p1), %s986_s29, 4294967040  ;;  %s28_s10 = sadd.s32 1, %s2006_s3   ;;  %s2009_s17 = sld [smem:[#allocation19_spill]] }
 0x2d4   : > { %p25_p12 = scmp.ge.s32.totalorder %s28_s10, 4   ;;  %s2010_s29 = sld [smem:[#allocation25_spill]] }
 0x2d5   : > { %s2011_s30 = sld [smem:[#allocation20_spill]]  ;;  %s2013_s27 = smov %s1557_s28 }
 0x2d6   : > { %s2012_s9 = sld [smem:[#allocation23_spill]]  ;;  %27 = sbr.rel (!%p25_p12) target bundleno = 14 (0xe), region = 140 }
 0x2d9   : > { %s2014_s28 = smov %s2009_s17 }
 0x2db   :  { %991 = vsyncpa [#allocation5], 1 }
 0x2dc   :  { %993 = vsyncpa [#allocation5 + $0x1], 1 }
 0x2dd   :  { %994 = vsyncpa [#allocation8], 1 }
 0x2de   :  { %996 = vsyncpa [#allocation8 + $0x1], 1 }
 0x2df   :  { %997 = vsyncpa [#allocation11], 1 }
 0x2e0   :  { %998 = vsyncpa [#allocation6], 1 }
 0x2e1   :  { %1000 = vsyncpa [#allocation6 + $0x1], 1 }

</bundles_post_ra>
